<compile_context>
chip_gen: v5e
topology: v5e:2x2
jax: 0.10.0
libtpu: 0.0.40
codegen_flags: <defaults>
</compile_context>

<pallas_src>
from functools import partial
from typing import NamedTuple

import jax
import jax.numpy as jnp
from jax.experimental import pallas as pl
from jax.experimental.pallas import tpu as pltpu

NEG_MASK = -1e30  # masks padded policy lanes before max / logsumexp


def _round_up(x, m):
    return ((x + m - 1) // m) * m


class PVNetMeta(NamedTuple):
    proj: int       # proj_size P
    policy: int     # policy_size
    v_pad: int      # padded vocab per embedding branch
    kf: int         # 4 * v_pad (rows of fused table)
    lanes: int      # lane width of all padded weights / outputs (multiple of 128)


# ---------------------------------------------------------------------------
# Pallas kernel: fused embeddings + MLP trunk + policy/value heads
# ---------------------------------------------------------------------------
def _pvnet_kernel(idx_ref, w_ref, b_ref, out_ref, *, meta: PVNetMeta):
    tb = out_ref.shape[0]
    lanes, kf = meta.lanes, meta.kf
    P, PS = meta.proj, meta.policy

    # ---- fused gather + concat + joint_linear1(+bias) via one one-hot matmul ----
    # Indices are pre-offset per branch in the wrapper (branch k -> +k*v_pad), so
    # the 4 branch masks land in disjoint regions and combine with a logical OR;
    # a single bf16 convert produces the (exact 0/1) MXU operand.
    idx = idx_ref[...]                                              # [tb, 4] i32
    k_iota = jax.lax.broadcasted_iota(jnp.int32, (tb, kf), 1)
    hit = k_iota == idx[:, 0][:, None]
    for k in range(1, 4):
        hit = jnp.logical_or(hit, k_iota == idx[:, k][:, None])
    onehot = hit.astype(jnp.bfloat16)

    # static, (8,128)-aligned views into the packed bf16 weight slab
    f_tab = w_ref[0:kf, :]                                          # fused embed@W1 (+b1/4)
    w2    = w_ref[kf:kf + lanes, :]
    wh    = w_ref[kf + lanes:kf + 2 * lanes, :]                     # [wp | wv] merged heads
    wpp   = w_ref[kf + 2 * lanes:kf + 3 * lanes, :]

    b2  = b_ref[0:1, :]
    bh  = b_ref[1:2, :]
    bpp = b_ref[2:3, :]    # real bias in [0,PS), NEG_MASK beyond -> padded lanes masked
    wvp = b_ref[3:4, :]    # value-pred weights placed at lanes [P, 2P), zeros elsewhere
    bvp = b_ref[4:5, 0:1]  # scalar value-pred bias

    # joint_linear1 bias is folded into the fused tables at pack time.
    h1 = jnp.maximum(
        jnp.dot(onehot, f_tab, preferred_element_type=jnp.float32), 0.0)
    h2 = jnp.maximum(
        jnp.dot(h1.astype(jnp.bfloat16), w2, preferred_element_type=jnp.float32) + b2, 0.0)
    heads = jnp.maximum(
        jnp.dot(h2.astype(jnp.bfloat16), wh, preferred_element_type=jnp.float32) + bh, 0.0)
    # heads lanes: [0,P) = relu(policy_linear), [P,2P) = relu(value_linear), rest exactly 0

    # ---- policy head: log_softmax over lanes [0, PS) (padded lanes at -1e30) ----
    logits = jnp.dot(heads.astype(jnp.bfloat16), wpp,
                     preferred_element_type=jnp.float32) + bpp
    m = jnp.max(logits, axis=1, keepdims=True)
    z = logits - m
    lse = jnp.log(jnp.sum(jnp.exp(z), axis=1, keepdims=True))
    logp = z - lse

    # ---- value head: VPU multiply + cross-lane sum, scalar-column tanh ----
    vsum = jnp.sum(heads * wvp, axis=1, keepdims=True)              # [tb, 1]
    v = jnp.tanh(vsum + bvp)                                        # [tb, 1]

    # ---- single lane-dense output slab: value at lane PS, logp elsewhere ----
    lane = jax.lax.broadcasted_iota(jnp.int32, (tb, lanes), 1)
    out_ref[...] = jnp.where(lane == PS, v, logp)


# ---------------------------------------------------------------------------
# Forward pass (wrapper)
# ---------------------------------------------------------------------------
def pvnet_forward(meta: PVNetMeta, packed, x_p, x_l):
    """x_p: int [B, >=1], x_l: int [B, >=3]. Returns (log_policy [B,PS], value [B,1])."""
    w_slab, b_slab = packed["w_slab"], packed["b_slab"]
    B = x_p.shape[0]
    lanes, v_pad = meta.lanes, meta.v_pad

    # [B, 4] index matrix, pre-offset so branch k indexes rows [k*v_pad,(k+1)*v_pad)
    # of the stacked fused table (branch order must match the table stacking).
    idx = jnp.concatenate([x_p[:, :1], x_l[:, :3]], axis=1).astype(jnp.int32)
    idx = idx + jnp.arange(4, dtype=jnp.int32)[None, :] * v_pad

    # Large batch tiles amortize per-step grid overhead; once B exceeds one small
    # tile, force >=2 grid steps so the "parallel" axis spans both TCs on v7x.
    tile_cap = 512
    if B <= 16:
        tile_b = _round_up(max(B, 1), 8)
    else:
        tile_b = min(tile_cap, _round_up((B + 1) // 2, 8))
    bp = _round_up(B, tile_b)
    if bp != B:
        idx = jnp.pad(idx, ((0, bp - B), (0, 0)))

    out = pl.pallas_call(
        partial(_pvnet_kernel, meta=meta),
        out_shape=jax.ShapeDtypeStruct((bp, lanes), jnp.float32),
        grid_spec=pltpu.PrefetchScalarGridSpec(
            num_scalar_prefetch=0,
            grid=(bp // tile_b,),
            in_specs=[
                pl.BlockSpec((tile_b, 4), lambda i: (i, 0)),          # indices, batch-tiled
                # TODO(synk): on v7x with realistic vocab sizes (multi-MiB fused table)
                # add pipeline_mode=pl.Buffered(1) to these two resident specs --
                # constant index_map makes double-buffering pure VMEM waste.
                pl.BlockSpec(w_slab.shape, lambda i: (0, 0)),         # bf16 weight slab, resident
                pl.BlockSpec(b_slab.shape, lambda i: (0, 0)),         # f32 bias slab, resident
            ],
            out_specs=pl.BlockSpec((tile_b, lanes), lambda i: (i, 0)),
        ),
        compiler_params=pltpu.CompilerParams(
            dimension_semantics=("parallel",),
            vmem_limit_bytes=32 * 1024 * 1024,   # <=48 MiB keeps headroom on v7x (64 MiB)
        ),
    )(idx, w_slab, b_slab)

    log_policy = out[:B, :meta.policy]
    value = out[:B, meta.policy:meta.policy + 1]
    return log_policy, value


# ---------------------------------------------------------------------------
# Parameters: raw (PyTorch-shaped) init + one-time packing into kernel layout
# Linear weights are stored transposed as [in, out] so x @ W + b == PyTorch.
# ---------------------------------------------------------------------------
def init_params(key, lower_size, prev_size, policy_size, hidden_size=64, proj_size=32):
    ks = jax.random.split(key, 16)
    scale = 0.05

    def w(k, shape):
        return (scale * jax.random.normal(k, shape)).astype(jnp.float32)

    H, P = hidden_size, proj_size
    return {
        "embed_l1": w(ks[0], (lower_size, H)),
        "embed_l2": w(ks[1], (lower_size, H)),
        "embed_l3": w(ks[2], (lower_size, H)),
        "embed_p":  w(ks[3], (prev_size, H)),
        "w1":  w(ks[4], (4 * H, H)),        "b1":  w(ks[5],  (1, H)),
        "w2":  w(ks[6], (H, H)),            "b2":  w(ks[7],  (1, H)),
        "wp":  w(ks[8], (H, P)),            "bp":  w(ks[9],  (1, P)),
        "wpp": w(ks[10], (P, policy_size)), "bpp": w(ks[11], (1, policy_size)),
        "wv":  w(ks[12], (H, P)),           "bv":  w(ks[13], (1, P)),
        "wvp": w(ks[14], (P, 1)),           "bvp": w(ks[15], (1, 1)),
    }


def pack_params(raw):
    """One-time repack into (bf16 weight slab, f32 bias slab) + static meta."""
    H = raw["w1"].shape[1]
    P = raw["wp"].shape[1]
    PS = raw["wpp"].shape[1]
    lower = raw["embed_l1"].shape[0]
    prev = raw["embed_p"].shape[0]

    lanes = _round_up(max(128, H, 2 * P, PS + 1), 128)
    v_pad = _round_up(max(lower, prev), 32)
    kf = 4 * v_pad

    def pad2(a, rows, cols, fill=0.0):
        return jnp.pad(a, ((0, rows - a.shape[0]), (0, cols - a.shape[1])),
                       constant_values=fill)

    # Fused tables: embed_k @ (block k of joint_linear1) + b1/4.  Gather + concat
    # + linear1 + bias becomes a single one-hot matmul against the stacked table
    # (each one-hot row has exactly 4 ones, so the 4 copies of b1/4 sum to b1).
    tables = [raw["embed_p"], raw["embed_l1"], raw["embed_l2"], raw["embed_l3"]]
    fused = []
    for k, t in enumerate(tables):
        blk = raw["w1"][k * H:(k + 1) * H, :]               # [H, H]
        fused.append(pad2(t @ blk + raw["b1"] / 4.0, v_pad, lanes))
    f_stack = jnp.concatenate(fused, axis=0)                # [kf, lanes]

    w2p  = pad2(raw["w2"], lanes, lanes)
    whp  = pad2(jnp.concatenate([raw["wp"], raw["wv"]], axis=1), lanes, lanes)
    wppp = pad2(raw["wpp"], lanes, lanes)
    # bf16 slab: MXU-native single-pass matmuls, half the DMA bytes / resident VMEM.
    w_slab = jnp.concatenate([f_stack, w2p, whp, wppp], axis=0).astype(jnp.bfloat16)

    def pad_row(b, fill=0.0):
        b = b.reshape(1, -1)
        return jnp.pad(b, ((0, 0), (0, lanes - b.shape[1])), constant_values=fill)

    b2r  = pad_row(raw["b2"])
    bhr  = pad_row(jnp.concatenate([raw["bp"], raw["bv"]], axis=1))
    bppr = pad_row(raw["bpp"], fill=NEG_MASK)
    wvpr = jnp.zeros((1, lanes), jnp.float32).at[0, P:2 * P].set(raw["wvp"].reshape(-1))
    bvpr = jnp.zeros((1, lanes), jnp.float32).at[0, 0].set(raw["bvp"].reshape(())[()])
    b_slab = jnp.concatenate(
        [b2r, bhr, bppr, wvpr, bvpr, jnp.zeros((3, lanes), jnp.float32)], axis=0)

    meta = PVNetMeta(proj=P, policy=PS, v_pad=v_pad, kf=kf, lanes=lanes)
    return {"w_slab": w_slab, "b_slab": b_slab}, meta


# ---------------------------------------------------------------------------
# Plain-JAX reference (mirrors the PyTorch forward) for correctness checking
# ---------------------------------------------------------------------------
def pvnet_reference(params, x_p, x_l):
    x_p_e  = jnp.take(params["embed_p"],  x_p[:, 0], axis=0)
    x_l_e1 = jnp.take(params["embed_l1"], x_l[:, 0], axis=0)
    x_l_e2 = jnp.take(params["embed_l2"], x_l[:, 1], axis=0)
    x_l_e3 = jnp.take(params["embed_l3"], x_l[:, 2], axis=0)
    joined = jnp.concatenate([x_p_e, x_l_e1, x_l_e2, x_l_e3], axis=-1)
    h1 = jax.nn.relu(joined @ params["w1"] + params["b1"])
    h2 = jax.nn.relu(h1 @ params["w2"] + params["b2"])
    ph = jax.nn.relu(h2 @ params["wp"] + params["bp"])
    logp = jax.nn.log_softmax(ph @ params["wpp"] + params["bpp"], axis=1)
    vh = jax.nn.relu(h2 @ params["wv"] + params["bv"])
    v = jnp.tanh(vh @ params["wvp"] + params["bvp"])
    return logp, v


if __name__ == "__main__":
    key = jax.random.PRNGKey(0)
    k_param, k_xp, k_xl = jax.random.split(key, 3)

    batch       = 2
    lower_size  = 10
    prev_size   = 12
    policy_size = 16
    hidden_size = 64   # PyTorch module default
    proj_size   = 32   # PyTorch module default

    raw = init_params(k_param, lower_size, prev_size, policy_size,
                      hidden_size=hidden_size, proj_size=proj_size)
    packed, meta = pack_params(raw)

    x_p = jax.random.randint(k_xp, (batch, 1), 0, prev_size,  dtype=jnp.int32)
    x_l = jax.random.randint(k_xl, (batch, 3), 0, lower_size, dtype=jnp.int32)

    fwd = jax.jit(partial(pvnet_forward, meta))
    log_policy, value = fwd(packed, x_p, x_l)
    jax.block_until_ready((log_policy, value))

    assert log_policy.shape == (batch, policy_size)
    assert value.shape == (batch, 1)
    # log_softmax rows exponentiate to a distribution; tanh output inside (-1, 1).
    assert jnp.allclose(jnp.sum(jnp.exp(log_policy), axis=1), 1.0, atol=1e-5)
    assert bool(jnp.all(jnp.abs(value) < 1.0))

    # Cross-check against the straightforward (unfused, unpadded, f32) formulation.
    # bf16 matmul operands truncate weights/activations (~0.4% rel.), so the
    # tolerance is loosened from 2e-3 to 5e-3 absolute.
    ref_logp, ref_value = jax.jit(pvnet_reference)(raw, x_p, x_l)
    assert jnp.allclose(log_policy, ref_logp, atol=5e-3), "policy mismatch vs reference"
    assert jnp.allclose(value, ref_value, atol=5e-3), "value mismatch vs reference"

    print("KERNEL_OK")
</pallas_src>

<mosaic_0001>
module attributes {stable_mosaic.version = 11 : i64} {
  func.func @_pvnet_kernel(%arg0: i32, %arg1: memref<8x4xi32, #tpu.memory_space<vmem>>, %arg2: memref<512x128xbf16, #tpu.memory_space<vmem>>, %arg3: memref<8x128xf32, #tpu.memory_space<vmem>>, %arg4: memref<8x128xf32, #tpu.memory_space<vmem>>) attributes {dimension_semantics = [#tpu.dimension_semantics<parallel>], iteration_bounds = array<i64: 1>, scalar_prefetch = 0 : i64, scratch_operands = 0 : i64, tpu.core_type = #tpu.core_type<tc>, window_params = [{transform_indices = @transform_0, window_bounds = array<i64: 8, 4>}, {pipeline_mode = #tpu.pipeline_mode<synchronous>, transform_indices = @transform_1, window_bounds = array<i64: 512, 128>}, {pipeline_mode = #tpu.pipeline_mode<synchronous>, transform_indices = @transform_2, window_bounds = array<i64: 8, 128>}, {transform_indices = @transform_3, window_bounds = array<i64: 8, 128>}]} {
    %c0 = arith.constant 0 : index
    %c0_0 = arith.constant 0 : index
    %0 = vector.load %arg1[%c0, %c0_0] : memref<8x4xi32, #tpu.memory_space<vmem>>, vector<8x4xi32>
    %1 = tpu.iota {dimensions = array<i32: 1>} : vector<8x128xi32>
    %2 = vector.extract_strided_slice %0 {offsets = [0, 0], sizes = [8, 1], strides = [1, 1]} : vector<8x4xi32> to vector<8x1xi32>
    %3 = vector.shape_cast %2 : vector<8x1xi32> to vector<8xi32>
    %4 = vector.shape_cast %3 : vector<8xi32> to vector<8x1xi32>
    %5 = vector.broadcast %4 : vector<8x1xi32> to vector<8x128xi32>
    %6 = arith.cmpi eq, %1, %5 : vector<8x128xi32>
    %7 = vector.extract_strided_slice %0 {offsets = [0, 1], sizes = [8, 1], strides = [1, 1]} : vector<8x4xi32> to vector<8x1xi32>
    %8 = vector.shape_cast %7 : vector<8x1xi32> to vector<8xi32>
    %9 = vector.shape_cast %8 : vector<8xi32> to vector<8x1xi32>
    %10 = vector.broadcast %9 : vector<8x1xi32> to vector<8x128xi32>
    %11 = arith.cmpi eq, %1, %10 : vector<8x128xi32>
    %12 = arith.ori %6, %11 : vector<8x128xi1>
    %13 = vector.extract_strided_slice %0 {offsets = [0, 2], sizes = [8, 1], strides = [1, 1]} : vector<8x4xi32> to vector<8x1xi32>
    %14 = vector.shape_cast %13 : vector<8x1xi32> to vector<8xi32>
    %15 = vector.shape_cast %14 : vector<8xi32> to vector<8x1xi32>
    %16 = vector.broadcast %15 : vector<8x1xi32> to vector<8x128xi32>
    %17 = arith.cmpi eq, %1, %16 : vector<8x128xi32>
    %18 = arith.ori %12, %17 : vector<8x128xi1>
    %19 = vector.extract_strided_slice %0 {offsets = [0, 3], sizes = [8, 1], strides = [1, 1]} : vector<8x4xi32> to vector<8x1xi32>
    %20 = vector.shape_cast %19 : vector<8x1xi32> to vector<8xi32>
    %21 = vector.shape_cast %20 : vector<8xi32> to vector<8x1xi32>
    %22 = vector.broadcast %21 : vector<8x1xi32> to vector<8x128xi32>
    %23 = arith.cmpi eq, %1, %22 : vector<8x128xi32>
    %24 = arith.ori %18, %23 : vector<8x128xi1>
    %25 = arith.extui %24 : vector<8x128xi1> to vector<8x128xi32>
    %26 = arith.sitofp %25 : vector<8x128xi32> to vector<8x128xf32>
    %27 = arith.truncf %26 : vector<8x128xf32> to vector<8x128xbf16>
    %c0_1 = arith.constant 0 : index
    %c0_2 = arith.constant 0 : index
    %28 = vector.load %arg2[%c0_1, %c0_2] : memref<512x128xbf16, #tpu.memory_space<vmem>>, vector<128x128xbf16>
    %c128 = arith.constant 128 : index
    %c0_3 = arith.constant 0 : index
    %29 = vector.load %arg2[%c128, %c0_3] : memref<512x128xbf16, #tpu.memory_space<vmem>>, vector<128x128xbf16>
    %c256 = arith.constant 256 : index
    %c0_4 = arith.constant 0 : index
    %30 = vector.load %arg2[%c256, %c0_4] : memref<512x128xbf16, #tpu.memory_space<vmem>>, vector<128x128xbf16>
    %c384 = arith.constant 384 : index
    %c0_5 = arith.constant 0 : index
    %31 = vector.load %arg2[%c384, %c0_5] : memref<512x128xbf16, #tpu.memory_space<vmem>>, vector<128x128xbf16>
    %c0_6 = arith.constant 0 : index
    %c0_7 = arith.constant 0 : index
    %32 = vector.load %arg3[%c0_6, %c0_7] : memref<8x128xf32, #tpu.memory_space<vmem>>, vector<1x128xf32>
    %c1 = arith.constant 1 : index
    %c0_8 = arith.constant 0 : index
    %33 = vector.load %arg3[%c1, %c0_8] : memref<8x128xf32, #tpu.memory_space<vmem>>, vector<1x128xf32>
    %c2 = arith.constant 2 : index
    %c0_9 = arith.constant 0 : index
    %34 = vector.load %arg3[%c2, %c0_9] : memref<8x128xf32, #tpu.memory_space<vmem>>, vector<1x128xf32>
    %c3 = arith.constant 3 : index
    %c0_10 = arith.constant 0 : index
    %35 = vector.load %arg3[%c3, %c0_10] : memref<8x128xf32, #tpu.memory_space<vmem>>, vector<1x128xf32>
    %c4 = arith.constant 4 : index
    %c0_11 = arith.constant 0 : index
    %36 = vector.load %arg3[%c4, %c0_11] : memref<8x128xf32, #tpu.memory_space<vmem>>, vector<1x1xf32>
    %cst = arith.constant dense<0.000000e+00> : vector<8x128xf32>
    %37 = tpu.matmul %27, %28, %cst {dimension_numbers = #tpu.dot_dimension_numbers<[1], [0], [0], [1], [0, 0, 1, 1], [], []>} : vector<8x128xbf16>, vector<128x128xbf16>, vector<8x128xf32> -> vector<8x128xf32>
    %cst_12 = arith.constant 0.000000e+00 : f32
    %38 = vector.broadcast %cst_12 : f32 to vector<8x128xf32>
    %39 = arith.maximumf %37, %38 : vector<8x128xf32>
    %40 = arith.truncf %39 : vector<8x128xf32> to vector<8x128xbf16>
    %cst_13 = arith.constant dense<0.000000e+00> : vector<8x128xf32>
    %41 = tpu.matmul %40, %29, %cst_13 {dimension_numbers = #tpu.dot_dimension_numbers<[1], [0], [0], [1], [0, 0, 1, 1], [], []>} : vector<8x128xbf16>, vector<128x128xbf16>, vector<8x128xf32> -> vector<8x128xf32>
    %42 = vector.broadcast %32 : vector<1x128xf32> to vector<8x128xf32>
    %43 = arith.addf %41, %42 : vector<8x128xf32>
    %cst_14 = arith.constant 0.000000e+00 : f32
    %44 = vector.broadcast %cst_14 : f32 to vector<8x128xf32>
    %45 = arith.maximumf %43, %44 : vector<8x128xf32>
    %46 = arith.truncf %45 : vector<8x128xf32> to vector<8x128xbf16>
    %cst_15 = arith.constant dense<0.000000e+00> : vector<8x128xf32>
    %47 = tpu.matmul %46, %30, %cst_15 {dimension_numbers = #tpu.dot_dimension_numbers<[1], [0], [0], [1], [0, 0, 1, 1], [], []>} : vector<8x128xbf16>, vector<128x128xbf16>, vector<8x128xf32> -> vector<8x128xf32>
    %48 = vector.broadcast %33 : vector<1x128xf32> to vector<8x128xf32>
    %49 = arith.addf %47, %48 : vector<8x128xf32>
    %cst_16 = arith.constant 0.000000e+00 : f32
    %50 = vector.broadcast %cst_16 : f32 to vector<8x128xf32>
    %51 = arith.maximumf %49, %50 : vector<8x128xf32>
    %52 = arith.truncf %51 : vector<8x128xf32> to vector<8x128xbf16>
    %cst_17 = arith.constant dense<0.000000e+00> : vector<8x128xf32>
    %53 = tpu.matmul %52, %31, %cst_17 {dimension_numbers = #tpu.dot_dimension_numbers<[1], [0], [0], [1], [0, 0, 1, 1], [], []>} : vector<8x128xbf16>, vector<128x128xbf16>, vector<8x128xf32> -> vector<8x128xf32>
    %54 = vector.broadcast %34 : vector<1x128xf32> to vector<8x128xf32>
    %55 = arith.addf %53, %54 : vector<8x128xf32>
    %cst_18 = arith.constant dense<0xFF800000> : vector<8xf32>
    %56 = vector.multi_reduction <maximumf>, %55, %cst_18 [1] : vector<8x128xf32> to vector<8xf32>
    %57 = vector.shape_cast %56 : vector<8xf32> to vector<8x1xf32>
    %58 = vector.broadcast %57 : vector<8x1xf32> to vector<8x128xf32>
    %59 = arith.subf %55, %58 : vector<8x128xf32>
    %60 = math.exp %59 : vector<8x128xf32>
    %cst_19 = arith.constant dense<0.000000e+00> : vector<8xf32>
    %61 = vector.multi_reduction <add>, %60, %cst_19 [1] : vector<8x128xf32> to vector<8xf32>
    %62 = vector.shape_cast %61 : vector<8xf32> to vector<8x1xf32>
    %63 = math.log %62 : vector<8x1xf32>
    %64 = vector.broadcast %63 : vector<8x1xf32> to vector<8x128xf32>
    %65 = arith.subf %59, %64 : vector<8x128xf32>
    %66 = vector.broadcast %35 : vector<1x128xf32> to vector<8x128xf32>
    %67 = arith.mulf %51, %66 : vector<8x128xf32>
    %cst_20 = arith.constant dense<0.000000e+00> : vector<8xf32>
    %68 = vector.multi_reduction <add>, %67, %cst_20 [1] : vector<8x128xf32> to vector<8xf32>
    %69 = vector.shape_cast %68 : vector<8xf32> to vector<8x1xf32>
    %70 = vector.broadcast %36 : vector<1x1xf32> to vector<8x1xf32>
    %71 = arith.addf %69, %70 : vector<8x1xf32>
    %72 = math.tanh %71 : vector<8x1xf32>
    %73 = tpu.iota {dimensions = array<i32: 1>} : vector<8x128xi32>
    %c16_i32 = arith.constant 16 : i32
    %74 = vector.broadcast %c16_i32 : i32 to vector<8x128xi32>
    %75 = arith.cmpi eq, %73, %74 : vector<8x128xi32>
    %76 = vector.shape_cast %72 : vector<8x1xf32> to vector<8x1xf32>
    %77 = vector.broadcast %76 : vector<8x1xf32> to vector<8x128xf32>
    %78 = arith.select %75, %77, %65 : vector<8x128xi1>, vector<8x128xf32>
    %c0_21 = arith.constant 0 : index
    %c0_22 = arith.constant 0 : index
    %79 = vector.load %arg4[%c0_21, %c0_22] : memref<8x128xf32, #tpu.memory_space<vmem>>, vector<8x128xf32>
    tpu.vector_store %arg4[%c0_21, %c0_22], %78 {strides = array<i32>} : memref<8x128xf32, #tpu.memory_space<vmem>>, vector<8x128xf32>,
    return
  }
  func.func @transform_0(%arg0: i32) -> (i32, i32) {
    %c0_i32 = arith.constant 0 : i32
    %c0_i32_0 = arith.constant 0 : i32
    return %arg0, %c0_i32 : i32, i32
  }
  func.func @transform_1(%arg0: i32) -> (i32, i32) {
    %c0_i32 = arith.constant 0 : i32
    %c0_i32_0 = arith.constant 0 : i32
    %c0_i32_1 = arith.constant 0 : i32
    return %c0_i32, %c0_i32_0 : i32, i32
  }
  func.func @transform_2(%arg0: i32) -> (i32, i32) {
    %c0_i32 = arith.constant 0 : i32
    %c0_i32_0 = arith.constant 0 : i32
    %c0_i32_1 = arith.constant 0 : i32
    return %c0_i32, %c0_i32_0 : i32, i32
  }
  func.func @transform_3(%arg0: i32) -> (i32, i32) {
    %c0_i32 = arith.constant 0 : i32
    %c0_i32_0 = arith.constant 0 : i32
    return %arg0, %c0_i32 : i32, i32
  }
}

</mosaic_0001>

<bundles_post_ra>
// kernel: pvnet_forward.1
= control target key start
LH: loop header
LB: loop body
LE: loop exit
PB: predicated region body
PF: predicated region fallthrough
CT: control target
= control target key end

     0   :  { %8 = vsyncpa [#allocation3], 0  ;;  %s621_s15 = smov [#allocation2]   ;;  %s622_s17 = smov 64   ;;  %s680_s0 = inlined_call_operand.vmem [shape: s32[8,4], index: 0, kind: input, shape index: {}]   ;;  %s681_s1 = inlined_call_operand.hbm [shape: bf16[512,128], index: 1, kind: input, shape index: {}]   ;;  %s682_s2 = inlined_call_operand.vmem [shape: f32[8,128], index: 2, kind: input, shape index: {}]   ;;  %s683_s3 = inlined_call_operand.vmem [shape: f32[8,128], index: 3, kind: output, shape index: {}]  }
   0x1   :  { %s15_s14 = sshll.u32 %s681_s1, 4  ;;  %s17_s16 = sshll.u32 %s621_s15, 4  ;;  %s16_s14 = int_to_ptr.hbm [resolvable:$true] %s15_s14  ;;  %s18_s16 = int_to_ptr.vmem [resolvable:$true] %s17_s16 }
   0x2   :  { %s623_s18 = smov 4  }
   0x3   :  { %23 = dma.hbm_to_vmem [thread:$0]  %s16_s14, 4096, %s18_s16, [#allocation3], %s622_s17, %s622_s17, %s623_s18  }
   0x4   :  { %619 = dma.done.wait [#allocation3], 4096  }
   0x5   :  { %620 = vsyncadd [#allocation3], 4294963200  ;;  %v624_v0 = vmov 0   ;;  %v625_v1 = vmov 2   ;;  %v30_v2 = vld [vmem:[%s680_s0] sm:$0xff]  ;;  %v545_v3 = vld [vmem:[#allocation2 + $0x38] sm:$0xff]  ;;  %v31_v21 = vlaneseq }
   0x6   :  { %578 = vset.pattern.permute.xlu0 %v624_v0  ;;  %580 = vset.pattern.permute.xlu1 %v625_v1  ;;  %v544_v4 = vld [vmem:[#allocation2 + $0x30] sm:$0xff]  ;;  %v543_v5 = vld [vmem:[#allocation2 + $0x28] sm:$0xff]  ;;  %v626_v6 = vmov 1   ;;  %v627_v7 = vmov 3   ;;  %v542_v8 = vld [vmem:[#allocation2 + $0x20] sm:$0xff] }
   0x7   :  { %582 = vset.pattern.permute.xlu2 %v624_v0  ;;  %34 = vperm.xlu0 %578, %v30_v2   ;;  %v541_v9 = vld [vmem:[#allocation2 + $0x18] sm:$0xff]  ;;  %v540_v10 = vld [vmem:[#allocation2 + $0x10] sm:$0xff]  ;;  %v539_v11 = vld [vmem:[#allocation2 + $0x8] sm:$0xff]  ;;  %v655_v23 = vand.u32 127, %v31_v21  ;;  %v628_v26 = vmov 1.0|1.0  }
   0x8   :  { %43 = vperm.xlu1 %580, %v30_v2   ;;  %172 = vmatpush.bf16.msra.mxu0 %v545_v3  ;;  %v538_v12 = vld [vmem:[#allocation2] sm:$0xff]  ;;  %v553_v13 = vld [vmem:[#allocation2 + $0x78] sm:$0xff]  ;;  %v552_v14 = vld [vmem:[#allocation2 + $0x70] sm:$0xff] }
   0x9   :  { %236 = vmatpush.bf16.msra.mxu1 %v553_v13  ;;  %v551_v15 = vld [vmem:[#allocation2 + $0x68] sm:$0xff]  ;;  %v550_v16 = vld [vmem:[#allocation2 + $0x60] sm:$0xff]  ;;  %v549_v17 = vld [vmem:[#allocation2 + $0x58] sm:$0xff]  ;;  %vm394_vm8 = vcmp.eq.s32.totalorder %v655_v23, 16 }
   0xa   :  { %v548_v20 = vld [vmem:[#allocation2 + $0x50] sm:$0xff]  ;;  %v547_v22 = vld [vmem:[#allocation2 + $0x48] sm:$0xff]  ;;  %v546_v27 = vld [vmem:[#allocation2 + $0x40] sm:$0xff] }
   0xb   :  { %v561_v28 = vld [vmem:[#allocation2 + $0xb8] sm:$0xff]  ;;  %v560_v29 = vld [vmem:[#allocation2 + $0xb0] sm:$0xff]  ;;  %v559_v30 = vld [vmem:[#allocation2 + $0xa8] sm:$0xff] }
   0xc   :  { %173 = vmatpush.bf16.msra.mxu0 %v544_v4  ;;  %300 = vmatpush.bf16.msra.mxu2 %v561_v28  ;;  %v558_v31 = vld [vmem:[#allocation2 + $0xa0] sm:$0xff]  ;;  %v557_v32 = vld [vmem:[#allocation2 + $0x98] sm:$0xff]  ;;  %v556_v33 = vld [vmem:[#allocation2 + $0x90] sm:$0xff] }
   0xd   :  { %237 = vmatpush.bf16.msra.mxu1 %v552_v14  ;;  %v555_v38 = vld [vmem:[#allocation2 + $0x88] sm:$0xff]  ;;  %v554_v39 = vld [vmem:[#allocation2 + $0x80] sm:$0xff]  ;;  %v569_v40 = vld [vmem:[#allocation2 + $0xf8] sm:$0xff] }
   0xe   :  { %364 = vmatpush.bf16.msra.mxu3 %v569_v40  ;;  %v568_v41 = vld [vmem:[#allocation2 + $0xf0] sm:$0xff]  ;;  %v567_v42 = vld [vmem:[#allocation2 + $0xe8] sm:$0xff]  ;;  %v566_v43 = vld [vmem:[#allocation2 + $0xe0] sm:$0xff] }
   0xf   :  { %579 = vset.pattern.permute.xlu0 %v626_v6  ;;  %v565_v44 = vld [vmem:[#allocation2 + $0xd8] sm:$0xff]  ;;  %v564_v45 = vld [vmem:[#allocation2 + $0xd0] sm:$0xff]  ;;  %v584_v46 = vld [vmem:[%s682_s2] ss:$0 sm:$0xff] }
  0x10   :  { %581 = vset.pattern.permute.xlu1 %v627_v7  ;;  %38 = vperm.xlu0 %579, %v30_v2   ;;  %v563_v52 = vld [vmem:[#allocation2 + $0xc8] sm:$0xff]  ;;  %v562_v53 = vld [vmem:[#allocation2 + $0xc0] sm:$0xff] }
  0x11   :  { %48 = vperm.xlu1 %581, %v30_v2   ;;  %174 = vmatpush.bf16.msra.mxu0 %v543_v5  ;;  %v585_v54 = vld [vmem:[%s682_s2 + $0x1] ss:$0 sm:$0xff]  ;;  %v586_v60 = vld [vmem:[%s682_s2 + $0x2] ss:$0 sm:$0xff]  ;;  %v587_v63 = vld [vmem:[%s682_s2 + $0x3] ss:$0 sm:$0xff] }
  0x12   :  { %238 = vmatpush.bf16.msra.mxu1 %v551_v15  ;;  %301 = vmatpush.bf16.msra.mxu2 %v560_v29  ;;  %v588_v5 = vld [vmem:[%s682_s2 + $0x4] ss:$0 sm:$0xff] }
  0x13   :  { %365 = vmatpush.bf16.msra.mxu3 %v568_v41 }
  0x15   :  { %175 = vmatpush.bf16.msra.mxu0 %v542_v8 }
  0x16   :  { %239 = vmatpush.bf16.msra.mxu1 %v550_v16  ;;  %302 = vmatpush.bf16.msra.mxu2 %v559_v30 }
  0x17   :  { %366 = vmatpush.bf16.msra.mxu3 %v567_v42 }
  0x18   :  { %583 = vset.pattern.permute.xlu0 %v624_v0 }
  0x19   :  { %176 = vmatpush.bf16.msra.mxu0 %v541_v9 }
  0x1a   :  { %240 = vmatpush.bf16.msra.mxu1 %v549_v17  ;;  %303 = vmatpush.bf16.msra.mxu2 %v558_v31 }
  0x1b   :  { %367 = vmatpush.bf16.msra.mxu3 %v566_v43 }
  0x1d   :  { %177 = vmatpush.bf16.msra.mxu0 %v540_v10 }
  0x1e   :  { %241 = vmatpush.bf16.msra.mxu1 %v548_v20  ;;  %304 = vmatpush.bf16.msra.mxu2 %v557_v32 }
  0x1f   :  { %368 = vmatpush.bf16.msra.mxu3 %v565_v44 }
  0x21   :  { %178 = vmatpush.bf16.msra.mxu0 %v539_v11 }
  0x22   :  { %242 = vmatpush.bf16.msra.mxu1 %v547_v22  ;;  %305 = vmatpush.bf16.msra.mxu2 %v556_v33 }
  0x23   :  { %369 = vmatpush.bf16.msra.mxu3 %v564_v45 }
  0x25   :  { %179 = vmatpush.bf16.msra.mxu0 %v538_v12 }
  0x26   :  { %243 = vmatpush.bf16.msra.mxu1 %v546_v27  ;;  %306 = vmatpush.bf16.msra.mxu2 %v555_v38 }
  0x27   :  { %370 = vmatpush.bf16.msra.mxu3 %v563_v52 }
  0x2a   :  { %307 = vmatpush.bf16.msra.mxu2 %v554_v39 }
  0x2b   :  { %371 = vmatpush.bf16.msra.mxu3 %v562_v53 }
  0x79   :  { %v35_v18 = vpop.permute.xlu0 %34 }
  0x7a   :  { %v44_v19 = vpop.permute.xlu1 %43  ;;  %vm36_vm0 = vcmp.eq.s32.totalorder %v655_v23, %v35_v18 }
  0x7b   :  { %vm45_vm3 = vcmp.eq.s32.totalorder %v655_v23, %v44_v19 }
  0x82   :  { %v39_v24 = vpop.permute.xlu0 %38 }
  0x83   :  { %v49_v25 = vpop.permute.xlu1 %48  ;;  %vm40_vm1 = vcmp.eq.s32.totalorder %v655_v23, %v39_v24 }
  0x84   :  { %vm50_vm2 = vcmp.eq.s32.totalorder %v655_v23, %v49_v25  ;;  %vm41_vm4 = vmor %vm36_vm0, %vm40_vm1 }
  0x85   :  { %vm46_vm5 = vmor %vm41_vm4, %vm45_vm3 }
  0x86   :  { %vm51_vm6 = vmor %vm46_vm5, %vm50_vm2 }
  0x87   :  { %vm440_vm7 = vmpackc.low %vm51_vm6, %vm51_vm6 }
  0x88   :  { %441 = vmatmul.msk.bf16.vlgmr.msra.gmra.mxu0 %vm440_vm7, %v628_v26 }
 0x105   :  { %v181_v34 = vpop.f32.mrf.mxu0 }
 0x106   :  { %v185_v35 = vmax.f32 %v181_v34, 0.0 }
 0x108   :  { %v186_v36 = vpack.c.bf16 %v185_v35, %v185_v35 }
 0x10a   :  { %244 = vmatmul.bf16.vlgmr.msra.gmra.mxu1 %v186_v36 }
 0x10d   :  { %v183_v37 = vpop.f32.mrf.mxu0 }
 0x187   :  { %v245_v47 = vpop.f32.mrf.mxu1 }
 0x188   :  { %v246_v48 = vadd.f32 %v584_v46, %v245_v47 }
 0x18a   :  { %v249_v49 = vmax.f32 %v246_v48, 0.0 }
 0x18c   :  { %v250_v50 = vpack.c.bf16 %v249_v49, %v249_v49 }
 0x18e   :  { %308 = vmatmul.bf16.vlgmr.msra.gmra.mxu2 %v250_v50 }
 0x18f   :  { %v247_v51 = vpop.f32.mrf.mxu1 }
 0x211   :  { %v309_v55 = vpop.f32.mrf.mxu2 }
 0x212   :  { %v310_v56 = vadd.f32 %v585_v54, %v309_v55 }
 0x214   :  { %v313_v57 = vmax.f32 %v310_v56, 0.0 }
 0x216   :  { %v314_v58 = vpack.c.bf16 %v313_v57, %v313_v57  ;;  %v388_v1 = vmul.f32 %v587_v63, %v313_v57 }
 0x218   :  { %372 = vmatmul.bf16.vlgmr.msra.gmra.mxu3 %v314_v58 }
 0x219   :  { %v311_v59 = vpop.f32.mrf.mxu2 }
 0x29b   :  { %v373_v61 = vpop.f32.mrf.mxu3 }
 0x29c   :  { %v374_v62 = vadd.f32 %v586_v60, %v373_v61 }
 0x29e   :  { %377 = vmax.xlane.f32.xlu2 %v374_v62 }
 0x2a3   :  { %v375_v0 = vpop.f32.mrf.mxu3 }
 0x2a6   :  { %389 = vadd.xlane.f32.xlu2 %v388_v1 }
 0x311   :  { %v378_v2 = vpop.xlane.xlu2 %377 }
 0x312   :  { %v379_v3 = vsub.f32 %v374_v62, %v378_v2 }
 0x314   :  { %v380_v4 = vmul.f32 1.442695, %v379_v3 }
 0x316   :  { %589 = vpow2.f32 %v380_v4 }
 0x319   :  { %v390_v6 = vpop.xlane.xlu2 %389 }
 0x31a   :  { %v392_v7 = vadd.f32 %v588_v5, %v390_v6 }
 0x31c   :  { %v590_v8 = vpop.eup %589  ;;  %591 = vtanh.f32 %v392_v7 }
 0x31d   :  { %382 = vadd.xlane.f32.xlu1 %v590_v8 }
 0x322   :  { %v592_v9 = vpop.eup %591 }
 0x323   :  { %397 = vperm.xlu2 %582, %v592_v9  }
 0x37d   :  { %v398_v14 = vpop.permute.xlu2 %397 }
 0x390   :  { %v383_v10 = vpop.xlane.xlu1 %382 }
 0x391   :  { %593 = vlog2.f32 %v383_v10 }
 0x397   :  { %v594_v11 = vpop.eup %593 }
 0x398   :  { %v385_v12 = vmul.f32 0.6931472, %v594_v11 }
 0x39a   :  { %v386_v13 = vsub.f32 %v379_v3, %v385_v12 }
 0x39c   :  { %v400_v15 = vsel %vm394_vm8, %v398_v14, %v386_v13 }
 0x39d   :  { %401 = vst [vmem:[%s683_s3] sm:$0xff] %v400_v15 }
 0x39e   :  { %406 = vsyncpa [#allocation3], 1 }

</bundles_post_ra>
